<compile_context>
chip_gen: v7x
topology: tpu7x:2x2x1
jax: 0.10.0
libtpu: 0.0.40
codegen_flags: <defaults>
</compile_context>

<pallas_src>
import functools

import jax
import jax.numpy as jnp
from jax.experimental import pallas as pl
from jax.experimental.pallas import tpu as pltpu


def _round_up(n, m):
    return (n + m - 1) // m * m


def _mlp_kernel(x_ref, w1_ref, b1_ref, w2_ref, b2_ref, w3_ref, b3_ref, o_ref):
    # Layer 1: Linear (bf16 MXU operands, f32 accumulation) + bias + ReLU in f32.
    # Dropout -> identity at eval.
    h1 = jnp.dot(x_ref[...], w1_ref[...], preferred_element_type=jnp.float32)
    h1 = jnp.maximum(h1 + b1_ref[...], 0.0)
    # Layer 2: Linear + ReLU (Dropout -> identity at eval).
    h2 = jnp.dot(h1.astype(jnp.bfloat16), w2_ref[...],
                 preferred_element_type=jnp.float32)
    h2 = jnp.maximum(h2 + b2_ref[...], 0.0)
    # Layer 3: Linear -> logits, stored narrow (num_classes wide), no padded slab.
    out = jnp.dot(h2.astype(jnp.bfloat16), w3_ref[...],
                  preferred_element_type=jnp.float32)
    o_ref[...] = (out + b3_ref[...]).astype(o_ref.dtype)


@functools.partial(jax.jit, static_argnames=("block_b",))
def gesture_classifier_forward(x, params, *, block_b=2048):
    """x: (B, input_size) float32.
    params: kernel-ready dict — bf16 weights transposed to (in, out), f32 biases (1, out)."""
    w1, b1, w2, b2, w3, b3 = (
        params["w1"], params["b1"], params["w2"],
        params["b2"], params["w3"], params["b3"],
    )
    B, in_size = x.shape
    hidden = w1.shape[1]
    num_classes = w3.shape[1]

    # Stream x as bf16 (halves the x HBM read and removes the per-tile VPU cast).
    x = x.astype(jnp.bfloat16)

    # Batch tile: multiple of 8 sublanes, capped at block_b rows.  When the
    # batch exceeds one minimal tile, aim for >= 2 grid steps so the "parallel"
    # batch axis can be sharded across both TensorCores on v7x.
    if B > 8:
        tb = min(block_b, _round_up(pl.cdiv(B, 2), 8))
    else:
        tb = _round_up(max(B, 1), 8)
    grid = (pl.cdiv(B, tb),)  # uneven last tile handled by Pallas edge blocks (no jnp.pad copy)

    resident = lambda i: (0, 0)  # weights/biases: same block every grid step -> stay in VMEM

    flops = 2 * B * (in_size * hidden + hidden * hidden + hidden * num_classes)
    bytes_accessed = (
        B * in_size * 2 + B * num_classes * 4                              # x (bf16) + logits (f32)
        + (in_size * hidden + hidden * hidden + hidden * num_classes) * 2  # bf16 weights
        + (2 * hidden + num_classes) * 4                                   # f32 biases
    )

    out = pl.pallas_call(
        _mlp_kernel,
        out_shape=jax.ShapeDtypeStruct((B, num_classes), jnp.float32),
        grid=grid,
        in_specs=[
            pl.BlockSpec((tb, in_size), lambda i: (i, 0)),   # x: batch-tiled (bf16)
            pl.BlockSpec((in_size, hidden), resident),       # w1 (bf16)
            pl.BlockSpec((1, hidden), resident),             # b1 (f32)
            pl.BlockSpec((hidden, hidden), resident),        # w2 (bf16)
            pl.BlockSpec((1, hidden), resident),             # b2 (f32)
            pl.BlockSpec((hidden, num_classes), resident),   # w3 (bf16, full dims)
            pl.BlockSpec((1, num_classes), resident),        # b3 (f32, full dims)
        ],
        out_specs=pl.BlockSpec((tb, num_classes), lambda i: (i, 0)),
        compiler_params=pltpu.CompilerParams(
            dimension_semantics=("parallel",),  # shard batch tiles across TCs (v7x megacore)
        ),
        cost_estimate=pl.CostEstimate(
            flops=flops, transcendentals=0, bytes_accessed=bytes_accessed),
    )(x, w1, b1, w2, b2, w3, b3)
    return out


def init_params(key, input_size, hidden_size, num_classes):
    """f32 reference params, nn.Linear-style init U[-1/sqrt(fan_in), 1/sqrt(fan_in)].
    Weights stored already transposed to (in, out); biases as (1, out)."""
    ks = jax.random.split(key, 6)

    def lin(kw, kb, fan_in, fan_out):
        bound = 1.0 / jnp.sqrt(jnp.float32(fan_in))
        w = jax.random.uniform(kw, (fan_in, fan_out), jnp.float32, -bound, bound)
        b = jax.random.uniform(kb, (1, fan_out), jnp.float32, -bound, bound)
        return w, b

    w1, b1 = lin(ks[0], ks[1], input_size, hidden_size)
    w2, b2 = lin(ks[2], ks[3], hidden_size, hidden_size)
    w3, b3 = lin(ks[4], ks[5], hidden_size, num_classes)
    return {"w1": w1, "b1": b1, "w2": w2, "b2": b2, "w3": w3, "b3": b3}


def prepare_params(params_f32):
    """Kernel-ready params: bf16 MXU weights, f32 biases (no lane padding needed)."""
    return {
        "w1": params_f32["w1"].astype(jnp.bfloat16),
        "b1": params_f32["b1"],            # f32: bias+ReLU stay on the f32 VPU path
        "w2": params_f32["w2"].astype(jnp.bfloat16),
        "b2": params_f32["b2"],
        "w3": params_f32["w3"].astype(jnp.bfloat16),
        "b3": params_f32["b3"],
    }


def _reference(x, p):
    """Pure-JAX reference of the PyTorch module in eval mode, using the same
    bf16-quantized operands the kernel sees (accumulation in f32)."""
    q = lambda a: a.astype(jnp.bfloat16).astype(jnp.float32)
    h1 = jnp.maximum(q(x) @ q(p["w1"]) + p["b1"], 0.0)
    h2 = jnp.maximum(q(h1) @ q(p["w2"]) + p["b2"], 0.0)
    return q(h2) @ q(p["w3"]) + p["b3"]


if __name__ == "__main__":
    # Small shapes consistent with a hand-landmark gesture classifier:
    # input_size = 63 features rounded to 64, hidden = 128, classes = 8, batch = 8.
    batch, input_size, hidden_size, num_classes = 8, 64, 128, 8

    key = jax.random.PRNGKey(0)
    k_x, k_p = jax.random.split(key)
    x = jax.random.normal(k_x, (batch, input_size), jnp.float32)

    params_f32 = init_params(k_p, input_size, hidden_size, num_classes)
    params = prepare_params(params_f32)

    out = gesture_classifier_forward(x, params)
    out = jax.block_until_ready(out)

    ref = _reference(x, params_f32)
    assert out.shape == (batch, num_classes)
    assert out.dtype == jnp.float32
    # Same bf16-quantized operands / f32 accumulation in kernel and reference:
    # only accumulation-order differences remain.
    assert jnp.allclose(out, ref, atol=2e-2, rtol=2e-2), "mismatch vs reference"

    print("KERNEL_OK")
</pallas_src>

<mosaic_0001>
module attributes {stable_mosaic.version = 11 : i64} {
  func.func @_mlp_kernel(%arg0: i32, %arg1: memref<8x64xbf16, #tpu.memory_space<vmem>>, %arg2: memref<64x128xbf16, #tpu.memory_space<vmem>>, %arg3: memref<1x128xf32, #tpu.memory_space<vmem>>, %arg4: memref<128x128xbf16, #tpu.memory_space<vmem>>, %arg5: memref<1x128xf32, #tpu.memory_space<vmem>>, %arg6: memref<128x8xbf16, #tpu.memory_space<vmem>>, %arg7: memref<1x8xf32, #tpu.memory_space<vmem>>, %arg8: memref<8x8xf32, #tpu.memory_space<vmem>>) attributes {dimension_semantics = [#tpu.dimension_semantics<parallel>], iteration_bounds = array<i64: 1>, scalar_prefetch = 0 : i64, scratch_operands = 0 : i64, tpu.core_type = #tpu.core_type<tc>, window_params = [{transform_indices = @transform_0, window_bounds = array<i64: 8, 64>}, {pipeline_mode = #tpu.pipeline_mode<synchronous>, transform_indices = @transform_1, window_bounds = array<i64: 64, 128>}, {pipeline_mode = #tpu.pipeline_mode<synchronous>, transform_indices = @transform_2, window_bounds = array<i64: 1, 128>}, {pipeline_mode = #tpu.pipeline_mode<synchronous>, transform_indices = @transform_3, window_bounds = array<i64: 128, 128>}, {pipeline_mode = #tpu.pipeline_mode<synchronous>, transform_indices = @transform_4, window_bounds = array<i64: 1, 128>}, {pipeline_mode = #tpu.pipeline_mode<synchronous>, transform_indices = @transform_5, window_bounds = array<i64: 128, 8>}, {pipeline_mode = #tpu.pipeline_mode<synchronous>, transform_indices = @transform_6, window_bounds = array<i64: 1, 8>}, {transform_indices = @transform_7, window_bounds = array<i64: 8, 8>}]} {
    %c0 = arith.constant 0 : index
    %c0_0 = arith.constant 0 : index
    %0 = vector.load %arg1[%c0, %c0_0] : memref<8x64xbf16, #tpu.memory_space<vmem>>, vector<8x64xbf16>
    %c0_1 = arith.constant 0 : index
    %c0_2 = arith.constant 0 : index
    %1 = vector.load %arg2[%c0_1, %c0_2] : memref<64x128xbf16, #tpu.memory_space<vmem>>, vector<64x128xbf16>
    %cst = arith.constant dense<0.000000e+00> : vector<8x128xf32>
    %2 = tpu.matmul %0, %1, %cst {dimension_numbers = #tpu.dot_dimension_numbers<[1], [0], [0], [1], [0, 0, 1, 1], [], []>} : vector<8x64xbf16>, vector<64x128xbf16>, vector<8x128xf32> -> vector<8x128xf32>
    %c0_3 = arith.constant 0 : index
    %c0_4 = arith.constant 0 : index
    %3 = vector.load %arg3[%c0_3, %c0_4] : memref<1x128xf32, #tpu.memory_space<vmem>>, vector<1x128xf32>
    %4 = vector.broadcast %3 : vector<1x128xf32> to vector<8x128xf32>
    %5 = arith.addf %2, %4 : vector<8x128xf32>
    %cst_5 = arith.constant 0.000000e+00 : f32
    %6 = vector.broadcast %cst_5 : f32 to vector<8x128xf32>
    %7 = arith.maximumf %5, %6 : vector<8x128xf32>
    %8 = arith.truncf %7 : vector<8x128xf32> to vector<8x128xbf16>
    %c0_6 = arith.constant 0 : index
    %c0_7 = arith.constant 0 : index
    %9 = vector.load %arg4[%c0_6, %c0_7] : memref<128x128xbf16, #tpu.memory_space<vmem>>, vector<128x128xbf16>
    %cst_8 = arith.constant dense<0.000000e+00> : vector<8x128xf32>
    %10 = tpu.matmul %8, %9, %cst_8 {dimension_numbers = #tpu.dot_dimension_numbers<[1], [0], [0], [1], [0, 0, 1, 1], [], []>} : vector<8x128xbf16>, vector<128x128xbf16>, vector<8x128xf32> -> vector<8x128xf32>
    %c0_9 = arith.constant 0 : index
    %c0_10 = arith.constant 0 : index
    %11 = vector.load %arg5[%c0_9, %c0_10] : memref<1x128xf32, #tpu.memory_space<vmem>>, vector<1x128xf32>
    %12 = vector.broadcast %11 : vector<1x128xf32> to vector<8x128xf32>
    %13 = arith.addf %10, %12 : vector<8x128xf32>
    %cst_11 = arith.constant 0.000000e+00 : f32
    %14 = vector.broadcast %cst_11 : f32 to vector<8x128xf32>
    %15 = arith.maximumf %13, %14 : vector<8x128xf32>
    %16 = arith.truncf %15 : vector<8x128xf32> to vector<8x128xbf16>
    %c0_12 = arith.constant 0 : index
    %c0_13 = arith.constant 0 : index
    %17 = vector.load %arg6[%c0_12, %c0_13] : memref<128x8xbf16, #tpu.memory_space<vmem>>, vector<128x8xbf16>
    %cst_14 = arith.constant dense<0.000000e+00> : vector<8x8xf32>
    %18 = tpu.matmul %16, %17, %cst_14 {dimension_numbers = #tpu.dot_dimension_numbers<[1], [0], [0], [1], [0, 0, 1, 1], [], []>} : vector<8x128xbf16>, vector<128x8xbf16>, vector<8x8xf32> -> vector<8x8xf32>
    %c0_15 = arith.constant 0 : index
    %c0_16 = arith.constant 0 : index
    %19 = vector.load %arg7[%c0_15, %c0_16] : memref<1x8xf32, #tpu.memory_space<vmem>>, vector<1x8xf32>
    %20 = vector.broadcast %19 : vector<1x8xf32> to vector<8x8xf32>
    %21 = arith.addf %18, %20 : vector<8x8xf32>
    %c0_17 = arith.constant 0 : index
    %c0_18 = arith.constant 0 : index
    %22 = vector.load %arg8[%c0_17, %c0_18] : memref<8x8xf32, #tpu.memory_space<vmem>>, vector<8x8xf32>
    tpu.vector_store %arg8[%c0_17, %c0_18], %21 {strides = array<i32>} : memref<8x8xf32, #tpu.memory_space<vmem>>, vector<8x8xf32>,
    return
  }
  func.func @transform_0(%arg0: i32) -> (i32, i32) {
    %c0_i32 = arith.constant 0 : i32
    %c0_i32_0 = arith.constant 0 : i32
    return %arg0, %c0_i32 : i32, i32
  }
  func.func @transform_1(%arg0: i32) -> (i32, i32) {
    %c0_i32 = arith.constant 0 : i32
    %c0_i32_0 = arith.constant 0 : i32
    %c0_i32_1 = arith.constant 0 : i32
    return %c0_i32, %c0_i32_0 : i32, i32
  }
  func.func @transform_2(%arg0: i32) -> (i32, i32) {
    %c0_i32 = arith.constant 0 : i32
    %c0_i32_0 = arith.constant 0 : i32
    %c0_i32_1 = arith.constant 0 : i32
    return %c0_i32, %c0_i32_0 : i32, i32
  }
  func.func @transform_3(%arg0: i32) -> (i32, i32) {
    %c0_i32 = arith.constant 0 : i32
    %c0_i32_0 = arith.constant 0 : i32
    %c0_i32_1 = arith.constant 0 : i32
    return %c0_i32, %c0_i32_0 : i32, i32
  }
  func.func @transform_4(%arg0: i32) -> (i32, i32) {
    %c0_i32 = arith.constant 0 : i32
    %c0_i32_0 = arith.constant 0 : i32
    %c0_i32_1 = arith.constant 0 : i32
    return %c0_i32, %c0_i32_0 : i32, i32
  }
  func.func @transform_5(%arg0: i32) -> (i32, i32) {
    %c0_i32 = arith.constant 0 : i32
    %c0_i32_0 = arith.constant 0 : i32
    %c0_i32_1 = arith.constant 0 : i32
    return %c0_i32, %c0_i32_0 : i32, i32
  }
  func.func @transform_6(%arg0: i32) -> (i32, i32) {
    %c0_i32 = arith.constant 0 : i32
    %c0_i32_0 = arith.constant 0 : i32
    %c0_i32_1 = arith.constant 0 : i32
    return %c0_i32, %c0_i32_0 : i32, i32
  }
  func.func @transform_7(%arg0: i32) -> (i32, i32) {
    %c0_i32 = arith.constant 0 : i32
    %c0_i32_0 = arith.constant 0 : i32
    return %arg0, %c0_i32 : i32, i32
  }
}

</mosaic_0001>

<bundles_post_ra>
// kernel: gesture_classifier_forward.1
= control target key start
LH: loop header
LB: loop body
LE: loop exit
PB: predicated region body
PF: predicated region fallthrough
CT: control target
= control target key end

     0   :  { %12 = vsyncpa [#allocation3], 0  ;;  %s701_s0 = inlined_call_operand.vmem [shape: bf16[8,64], index: 0, kind: input, shape index: {}]   ;;  %s702_s1 = inlined_call_operand.vmem [shape: bf16[64,128], index: 1, kind: input, shape index: {}]   ;;  %s703_s2 = inlined_call_operand.vmem [shape: f32[1,128], index: 2, kind: input, shape index: {}]   ;;  %s704_s3 = inlined_call_operand.vmem [shape: bf16[128,128], index: 3, kind: input, shape index: {}]   ;;  %s705_s4 = inlined_call_operand.vmem [shape: f32[1,128], index: 4, kind: input, shape index: {}]   ;;  %s706_s5 = inlined_call_operand.vmem [shape: bf16[128,8], index: 5, kind: input, shape index: {}]   ;;  %s707_s6 = inlined_call_operand.hbm [shape: f32[1,8], index: 6, kind: input, shape index: {}]   ;;  %s708_s7 = inlined_call_operand.hbm [shape: f32[8,8], index: 7, kind: output, shape index: {}]  }
   0x1   :  { %13 = vsyncpa [#allocation4], 0  ;;  %s538_s24 = smov [#allocation2]   ;;  %s490_s28 = scalar_lea.hbm %s707_s6, 16 }
   0x2   :  { %s32_s25 = sshll.u32 %s538_s24, 4  ;;  %p491_p0 = scmp.ne.s32.totalorder %s707_s6, %s490_s28  ;;  %s33_s25 = int_to_ptr.vmem [resolvable:$true] %s32_s25 }
   0x3   :  { %p494_p1 = scmp.lt.u32.totalorder %s490_s28, %s707_s6 }
   0x5   :  { %p496_p2 = pnand %p494_p1, %p491_p0 }
   0x7   :  { %499 = shalt.err (!%p496_p2)
}
   0x8   :  { %s500_s10 = scalar_lea.vmem %s33_s25, 16  ;;  %s504_s11 = scalar_lea.vmem %s33_s25, 32 }
   0x9   :  { %p501_p3 = scmp.ne.s32.totalorder %s33_s25, %s500_s10  ;;  %p505_p4 = scmp.lt.s32.totalorder %s33_s25, %s33_s25 }
   0xa   :  { %p506_p5 = scmp.lt.s32.totalorder %s504_s11, %s500_s10 }
   0xc   :  { %p507_p6 = por %p506_p5, %p505_p4 }
   0xe   :  { %p508_p7 = pnand %p507_p6, %p501_p3 }
  0x10   :  { %511 = shalt.err (!%p508_p7)
}
  0x11   :  { %35 = dma.hbm_to_vmem [thread:$0]  %s707_s6, 16, %s33_s25, [#allocation3]  }
  0x12   :  { %534 = dma.done.wait [#allocation3], 16  }
  0x13   :  { %535 = vsyncadd [#allocation3], 4294967280  ;;  %v539_v0 = vmov 0.0   ;;  %vm540_vm0 = vmmov 0   ;;  %v470_v1 = vld [vmem:[%s702_s1] sm:$0xff]   ;;  %v471_v2 = vld [vmem:[%s702_s1 + $0x8] sm:$0xff]  }
  0x14   :  { %414 = vmatprep.subr.bf16.mxu0 %v539_v0  ;;  %422 = vmatprep.mubr.msk.bf16.mxu0 %vm540_vm0, %v539_v0  ;;  %v474_v3 = vld [vmem:[%s704_s3] sm:$0xff]   ;;  %v472_v4 = vld [vmem:[%s702_s1 + $0x10] sm:$0xff]   ;;  %v475_v5 = vld [vmem:[%s704_s3 + $0x8] sm:$0xff]   ;;  %vm80_vm1 = vcmask 523264   ;;  %vm350_vm2 = vcmask 64512  }
  0x15   :  { %426 = vmatprep.subr.bf16.mxu1 %v539_v0  ;;  %442 = vmatprep.mubr.msk.bf16.mxu1 %vm540_vm0, %v539_v0  ;;  %v473_v6 = vld [vmem:[%s702_s1 + $0x18] sm:$0xff]   ;;  %v476_v7 = vld [vmem:[%s704_s3 + $0x10] sm:$0xff]   ;;  %v40_v8 = vld [vmem:[%s701_s0] sm:$0xf]  ;;  %s541_s1 = smov [#allocation5]  }
  0x16   :  { %415 = vmatpush3.bf16.msra.mxu0 %v470_v1  ;;  %427 = vmatpush3.bf16.msra.mxu1 %v474_v3  ;;  %v477_v9 = vld [vmem:[%s704_s3 + $0x18] sm:$0xff]   ;;  %v478_v10 = vld [vmem:[%s704_s3 + $0x20] sm:$0xff]   ;;  %v479_v11 = vld [vmem:[%s704_s3 + $0x28] sm:$0xff]   ;;  %s358_s8 = sshll.u32 %s541_s1, 4  ;;  %s359_s8 = int_to_ptr.vmem [resolvable:$true] %s358_s8 }
  0x17   :  { %416 = vmatprep.subr.bf16.mxu0 %v539_v0  ;;  %428 = vmatprep.subr.bf16.mxu1 %v539_v0  ;;  %v480_v12 = vld [vmem:[%s704_s3 + $0x30] sm:$0xff]   ;;  %v481_v13 = vld [vmem:[%s704_s3 + $0x38] sm:$0xff]   ;;  %v482_v14 = vld [vmem:[%s706_s5] sm:$0xff]   ;;  %p517_p9 = scmp.lt.s32.totalorder %s359_s8, %s359_s8 }
  0x18   :  { %v483_v15 = vld [vmem:[%s706_s5 + $0x8] sm:$0xff]   ;;  %v484_v16 = vld [vmem:[%s706_s5 + $0x10] sm:$0xff]   ;;  %v485_v17 = vld [vmem:[%s706_s5 + $0x18] sm:$0xff]  }
  0x19   :  { %v486_v18 = vld [vmem:[%s706_s5 + $0x20] sm:$0xff]   ;;  %v487_v19 = vld [vmem:[%s706_s5 + $0x28] sm:$0xff]   ;;  %v488_v28 = vld [vmem:[%s706_s5 + $0x30] sm:$0xff]  }
  0x1a   :  { %417 = vmatpush3.bf16.msra.mxu0 %v471_v2  ;;  %429 = vmatpush3.bf16.msra.mxu1 %v475_v5  ;;  %v367_v20 = vld [vmem:[%s703_s2] ss:$0 sm:$0xff]  ;;  %v489_v29 = vld [vmem:[%s706_s5 + $0x38] sm:$0xff]   ;;  %v382_v38 = vld [vmem:[#allocation2] ss:$0 sm:$0xff] }
  0x1b   :  { %418 = vmatprep.subr.bf16.mxu0 %v539_v0  ;;  %430 = vmatprep.subr.bf16.mxu1 %v539_v0  ;;  %v373_v30 = vld [vmem:[%s705_s4] ss:$0 sm:$0xff]  ;;  %s512_s4 = scalar_lea.vmem %s359_s8, 128 }
  0x1c   :  { %p513_p8 = scmp.ne.s32.totalorder %s359_s8, %s512_s4  ;;  %p518_p10 = scmp.lt.s32.totalorder %s512_s4, %s512_s4 }
  0x1e   :  { %419 = vmatpush3.bf16.msra.mxu0 %v472_v4  ;;  %431 = vmatpush3.bf16.msra.mxu1 %v476_v7  ;;  %p519_p11 = por %p518_p10, %p517_p9 }
  0x1f   :  { %420 = vmatprep.subr.bf16.mxu0 %v539_v0  ;;  %432 = vmatprep.subr.bf16.mxu1 %v539_v0 }
  0x20   :  { %p520_p12 = pnand %p519_p11, %p513_p8 }
  0x22   :  { %421 = vmatpush3.bf16.msra.mxu0 %v473_v6  ;;  %433 = vmatpush3.bf16.msra.mxu1 %v477_v9 }
  0x23   :  { %446 = vmatprep.subr.bf16.mxu0 %v539_v0  ;;  %434 = vmatprep.subr.bf16.mxu1 %v539_v0 }
  0x25   :  { %423 = vmatmul.mubr.msk.bf16.vlgmr.msra.gmra.mrb[0].mxu0 %vm80_vm1, %v40_v8 }
  0x26   :  { %462 = vmatprep.mubr.msk.bf16.mxu0 %vm540_vm0, %v539_v0  ;;  %435 = vmatpush3.bf16.msra.mxu1 %v478_v10 }
  0x27   :  { %436 = vmatprep.subr.bf16.mxu1 %v539_v0  ;;  %447 = vmatpush3.bf16.msra.mxu0 %v482_v14 }
  0x28   :  { %448 = vmatprep.subr.bf16.mxu0 %v539_v0 }
  0x2a   :  { %437 = vmatpush3.bf16.msra.mxu1 %v479_v11 }
  0x2b   :  { %438 = vmatprep.subr.bf16.mxu1 %v539_v0  ;;  %449 = vmatpush3.bf16.msra.mxu0 %v483_v15 }
  0x2c   :  { %450 = vmatprep.subr.bf16.mxu0 %v539_v0 }
  0x2e   :  { %439 = vmatpush3.bf16.msra.mxu1 %v480_v12 }
  0x2f   :  { %440 = vmatprep.subr.bf16.mxu1 %v539_v0  ;;  %451 = vmatpush3.bf16.msra.mxu0 %v484_v16 }
  0x30   :  { %452 = vmatprep.subr.bf16.mxu0 %v539_v0 }
  0x32   :  { %441 = vmatpush3.bf16.msra.mxu1 %v481_v13 }
  0x33   :  { %453 = vmatpush3.bf16.msra.mxu0 %v485_v17 }
  0x34   :  { %454 = vmatprep.subr.bf16.mxu0 %v539_v0 }
  0x37   :  { %455 = vmatpush3.bf16.msra.mxu0 %v486_v18 }
  0x38   :  { %456 = vmatprep.subr.bf16.mxu0 %v539_v0 }
  0x3b   :  { %457 = vmatpush3.bf16.msra.mxu0 %v487_v19 }
  0x3c   :  { %458 = vmatprep.subr.bf16.mxu0 %v539_v0 }
  0x3f   :  { %459 = vmatpush3.bf16.msra.mxu0 %v488_v28 }
  0x40   :  { %460 = vmatprep.subr.bf16.mxu0 %v539_v0 }
  0x43   :  { %461 = vmatpush3.bf16.msra.mxu0 %v489_v29 }
  0xf8   :  { %v118_v21 = vpop.f32.mrb[0].mxu0 }
  0xf9   :  { %v119_v22 = vadd.f32 %v367_v20, %v118_v21  ;;  %v424_v23 = vpop.f32.mrb[1].mxu0 }
  0xfa   :  { %v121_v24 = vpop.f32.mrb[2].mxu0 }
  0xfb   :  { %v124_v25 = vmax.f32 %v119_v22, 0.0  ;;  %v425_v26 = vpop.f32.mrb[3].mxu0 }
  0xfd   :  { %v125_v27 = vpack.c.bf16 %v124_v25, %v124_v25 }
  0xff   :  { %443 = vmatmul.mubr.bf16.vlgmr.msra.gmra.mrb[0].mxu1 %v125_v27 }
 0x1d2   :  { %v231_v31 = vpop.f32.mrb[0].mxu1 }
 0x1d3   :  { %v232_v32 = vadd.f32 %v373_v30, %v231_v31  ;;  %v444_v33 = vpop.f32.mrb[1].mxu1 }
 0x1d4   :  { %v234_v34 = vpop.f32.mrb[2].mxu1 }
 0x1d5   :  { %v237_v35 = vmax.f32 %v232_v32, 0.0  ;;  %v445_v36 = vpop.f32.mrb[3].mxu1 }
 0x1d7   :  { %v238_v37 = vpack.c.bf16 %v237_v35, %v237_v35 }
 0x1d9   :  { %463 = vmatmul.mubr.bf16.vlgmr.msra.gmra.mrb[4].mxu0 %v238_v37 }
 0x2ac   :  { %v344_v39 = vpop.f32.mrb[4].mxu0 }
 0x2ad   :  { %v345_v40 = vadd.f32 %v382_v38, %v344_v39  ;;  %v464_v41 = vpop.f32.mrb[5].mxu0 }
 0x2ae   :  { %v347_v42 = vpop.f32.mrb[6].mxu0 }
 0x2af   :  { %v465_v43 = vpop.f32.mrb[7].mxu0  ;;  %351 = vst.msk [vmem:[#allocation5] sm:$0xff] %vm350_vm2, %v345_v40 }
 0x2b0   :  { %523 = shalt.err (!%p520_p12)
}
 0x2b1   :  { %s524_s9 = scalar_lea.hbm %s708_s7, 128 }
 0x2b2   :  { %p525_p13 = scmp.ne.s32.totalorder %s708_s7, %s524_s9  ;;  %p528_p0 = scmp.lt.u32.totalorder %s524_s9, %s708_s7 }
 0x2b4   :  { %p530_p1 = pnand %p528_p0, %p525_p13 }
 0x2b6   :  { %533 = shalt.err (!%p530_p1)
}
 0x2b7   :  { %361 = dma.vmem_to_hbm [thread:$0]  %s359_s8, 128, %s708_s7, [#allocation4]  }
 0x2b8   :  { %536 = dma.done.wait [#allocation4], 128  }
 0x2b9   :  { %537 = vsyncadd [#allocation4], 4294967168 }
 0x2ba   :  { %365 = vsyncpa [#allocation3], 1 }
 0x2bb   :  { %366 = vsyncpa [#allocation4], 1 }

</bundles_post_ra>
